<compile_context>
chip_gen: v5e
topology: v5e:2x2
jax: 0.10.0
libtpu: 0.0.40
codegen_flags: <defaults>
</compile_context>

<pallas_src>
import functools

import jax
import jax.numpy as jnp
from jax.experimental import pallas as pl
from jax.experimental.pallas import tpu as pltpu


def _round_up(n, m):
    return ((n + m - 1) // m) * m


def actor_kernel(xT_ref, w1_ref, b1_ref, whT_ref, bh_ref, out_ref, *, bound):
    # Layer 1 on the MXU with batch in lanes: (H, Kp) @ (Kp, TB) -> (H, TB).
    hT = jnp.dot(w1_ref[...], xT_ref[...], preferred_element_type=jnp.float32)
    hT = jnp.maximum(hT + b1_ref[...], 0.0)        # bias + ReLU (idempotent, applied once)

    # Fused heads: (2, H) @ (H, TB) -> lane-dense (2, TB), single MXU pass.
    zT = jnp.dot(whT_ref[...], hT, preferred_element_type=jnp.float32)

    # Row 0 -> mu, row 1 -> sigma; transcendentals run on lane-dense rows only.
    out_ref[0:1, :] = bound * jnp.tanh(zT[0:1, :] + bh_ref[0])
    out_ref[1:2, :] = jnp.logaddexp(zT[1:2, :] + bh_ref[1], 0.0)   # stable softplus


def actor_forward(x, params, bound, *, tile_b=2048):
    """ActorNet forward as one batched-grid Pallas call.

    params use PyTorch nn.Linear layout:
      w1 (H, n_states), b1 (H,), wmu (1, H), bmu (1,), wsg (1, H), bsg (1,)
    Returns (mu, sigma), each (batch, 1).
    """
    w1, b1, wmu, bmu, wsg, bsg = params
    batch, n_states = x.shape
    hidden = w1.shape[0]

    # Pad the tiny contraction dim to 8 sublanes (zero rows contribute nothing).
    kp = _round_up(n_states, 8)
    xT = jnp.pad(x.T, ((0, kp - n_states), (0, 0)))          # (kp, B), lane-dense
    w1p = jnp.pad(w1, ((0, 0), (0, kp - n_states)))          # (H, kp)
    b1c = b1.reshape(hidden, 1)                              # broadcast over lanes

    # Fused heads: weights (2, H), biases (2,); row 0 = mu, row 1 = sigma.
    whT = jnp.concatenate([wmu, wsg], axis=0)                # (2, H)
    bh = jnp.concatenate([bmu.reshape(1), bsg.reshape(1)])   # (2,)

    # Batch tile: full batch if it fits in one tile, else a multiple of 128
    # lanes.  Lane-dense x/out blocks keep VMEM tiny, so tiles this size are
    # safe even under v7x's smaller scoped-VMEM default.
    if batch <= tile_b:
        tb = batch
    else:
        tb = _round_up(tile_b, 128)
    grid = (pl.cdiv(batch, tb),)   # partial tail tile: OOB writes dropped, sliced below

    cost = pl.CostEstimate(
        flops=int(2 * batch * (n_states * hidden + hidden * 2)),
        transcendentals=int(3 * batch),                       # tanh + exp + log1p per row
        bytes_accessed=int(4 * (batch * n_states + hidden * kp + hidden
                                + 2 * hidden + 2 + 2 * batch)),
    )

    kernel = functools.partial(actor_kernel, bound=float(bound))
    out = pl.pallas_call(
        kernel,
        out_shape=jax.ShapeDtypeStruct((2, batch), jnp.float32),
        grid=grid,
        in_specs=[
            pl.BlockSpec((kp, tb), lambda i: (0, i)),          # x^T: batch-tiled, lane-dense
            pl.BlockSpec((hidden, kp), lambda i: (0, 0)),      # W1: resident
            pl.BlockSpec((hidden, 1), lambda i: (0, 0)),       # b1: resident
            pl.BlockSpec((2, hidden), lambda i: (0, 0)),       # fused head W: resident
            pl.BlockSpec(memory_space=pltpu.MemorySpace.SMEM), # fused head bias
        ],
        out_specs=pl.BlockSpec((2, tb), lambda i: (0, i)),     # lane-dense (2, B) output
        compiler_params=pltpu.CompilerParams(
            dimension_semantics=("parallel",)),                # shards across v7x's 2 TCs
        cost_estimate=cost,
    )(xT, w1p, b1c, whT, bh)

    mu = out[0, :batch].reshape(batch, 1)
    sigma = out[1, :batch].reshape(batch, 1)
    return mu, sigma


def init_params(key, n_states, hidden=128):
    """Deterministic synthetic parameters in PyTorch nn.Linear (out, in) layout."""
    k1, k2, k3, k4, k5, k6 = jax.random.split(key, 6)
    s1 = 1.0 / jnp.sqrt(jnp.float32(n_states))
    s2 = 1.0 / jnp.sqrt(jnp.float32(hidden))
    w1 = jax.random.uniform(k1, (hidden, n_states), jnp.float32, -s1, s1)
    b1 = jax.random.uniform(k2, (hidden,), jnp.float32, -s1, s1)
    wmu = jax.random.uniform(k3, (1, hidden), jnp.float32, -s2, s2)
    bmu = jax.random.uniform(k4, (1,), jnp.float32, -s2, s2)
    wsg = jax.random.uniform(k5, (1, hidden), jnp.float32, -s2, s2)
    bsg = jax.random.uniform(k6, (1,), jnp.float32, -s2, s2)
    return w1, b1, wmu, bmu, wsg, bsg


def reference_forward(x, params, bound):
    """Pure-JAX reference mirroring the PyTorch module exactly."""
    w1, b1, wmu, bmu, wsg, bsg = params
    h = jnp.maximum(x @ w1.T + b1, 0.0)
    h = jnp.maximum(h, 0.0)                      # the extra F.relu
    mu = bound * jnp.tanh(h @ wmu.T + bmu)
    sigma = jax.nn.softplus(h @ wsg.T + bsg)
    return mu, sigma


if __name__ == "__main__":
    n_states = 3        # e.g. Pendulum-v1 observation dim
    batch = 8
    bound = 2.0

    key = jax.random.PRNGKey(0)
    k_x, k_p = jax.random.split(key)
    x = jax.random.normal(k_x, (batch, n_states), jnp.float32)
    params = init_params(k_p, n_states)

    mu, sigma = actor_forward(x, params, bound)
    jax.block_until_ready((mu, sigma))

    mu_ref, sigma_ref = reference_forward(x, params, bound)
    assert mu.shape == (batch, 1) and sigma.shape == (batch, 1)
    assert jnp.allclose(mu, mu_ref, atol=1e-5, rtol=1e-5)
    assert jnp.allclose(sigma, sigma_ref, atol=1e-5, rtol=1e-5)

    print("KERNEL_OK")
</pallas_src>

<mosaic_0001>
module attributes {stable_mosaic.version = 11 : i64} {
  func.func @actor_kernel(%arg0: i32, %arg1: memref<8x8xf32, #tpu.memory_space<vmem>>, %arg2: memref<128x8xf32, #tpu.memory_space<vmem>>, %arg3: memref<128x1xf32, #tpu.memory_space<vmem>>, %arg4: memref<2x128xf32, #tpu.memory_space<vmem>>, %arg5: memref<2xf32, #tpu.memory_space<smem>>, %arg6: memref<2x8xf32, #tpu.memory_space<vmem>>) attributes {dimension_semantics = [#tpu.dimension_semantics<parallel>], iteration_bounds = array<i64: 1>, scalar_prefetch = 0 : i64, scratch_operands = 0 : i64, tpu.core_type = #tpu.core_type<tc>, window_params = [{transform_indices = @transform_0, window_bounds = array<i64: 8, 8>}, {pipeline_mode = #tpu.pipeline_mode<synchronous>, transform_indices = @transform_1, window_bounds = array<i64: 128, 8>}, {pipeline_mode = #tpu.pipeline_mode<synchronous>, transform_indices = @transform_2, window_bounds = array<i64: 128, 1>}, {pipeline_mode = #tpu.pipeline_mode<synchronous>, transform_indices = @transform_3, window_bounds = array<i64: 2, 128>}, {transform_indices = @transform_4, window_bounds = array<i64: 2>}, {transform_indices = @transform_5, window_bounds = array<i64: 2, 8>}]} {
    %c0 = arith.constant 0 : index
    %c0_0 = arith.constant 0 : index
    %0 = vector.load %arg2[%c0, %c0_0] : memref<128x8xf32, #tpu.memory_space<vmem>>, vector<128x8xf32>
    %c0_1 = arith.constant 0 : index
    %c0_2 = arith.constant 0 : index
    %1 = vector.load %arg1[%c0_1, %c0_2] : memref<8x8xf32, #tpu.memory_space<vmem>>, vector<8x8xf32>
    %cst = arith.constant dense<0.000000e+00> : vector<128x8xf32>
    %2 = tpu.matmul %0, %1, %cst {dimension_numbers = #tpu.dot_dimension_numbers<[1], [0], [0], [1], [0, 0, 1, 1], [], []>} : vector<128x8xf32>, vector<8x8xf32>, vector<128x8xf32> -> vector<128x8xf32>
    %c0_3 = arith.constant 0 : index
    %c0_4 = arith.constant 0 : index
    %3 = vector.load %arg3[%c0_3, %c0_4] : memref<128x1xf32, #tpu.memory_space<vmem>>, vector<128x1xf32>
    %4 = vector.broadcast %3 : vector<128x1xf32> to vector<128x8xf32>
    %5 = arith.addf %2, %4 : vector<128x8xf32>
    %cst_5 = arith.constant 0.000000e+00 : f32
    %6 = vector.broadcast %cst_5 : f32 to vector<128x8xf32>
    %7 = arith.maximumf %5, %6 : vector<128x8xf32>
    %c0_6 = arith.constant 0 : index
    %c0_7 = arith.constant 0 : index
    %8 = vector.load %arg4[%c0_6, %c0_7] : memref<2x128xf32, #tpu.memory_space<vmem>>, vector<2x128xf32>
    %cst_8 = arith.constant dense<0.000000e+00> : vector<2x8xf32>
    %9 = tpu.matmul %8, %7, %cst_8 {dimension_numbers = #tpu.dot_dimension_numbers<[1], [0], [0], [1], [0, 0, 1, 1], [], []>} : vector<2x128xf32>, vector<128x8xf32>, vector<2x8xf32> -> vector<2x8xf32>
    %10 = vector.extract_strided_slice %9 {offsets = [0, 0], sizes = [1, 8], strides = [1, 1]} : vector<2x8xf32> to vector<1x8xf32>
    %c0_9 = arith.constant 0 : index
    %11 = memref.load %arg5[%c0_9] : memref<2xf32, #tpu.memory_space<smem>>
    %12 = vector.broadcast %11 : f32 to vector<1x8xf32>
    %13 = arith.addf %10, %12 : vector<1x8xf32>
    %14 = math.tanh %13 : vector<1x8xf32>
    %cst_10 = arith.constant 2.000000e+00 : f32
    %15 = vector.broadcast %cst_10 : f32 to vector<1x8xf32>
    %16 = arith.mulf %15, %14 : vector<1x8xf32>
    %c0_11 = arith.constant 0 : index
    %c0_12 = arith.constant 0 : index
    %17 = vector.load %arg6[%c0_11, %c0_12] : memref<2x8xf32, #tpu.memory_space<vmem>>, vector<1x8xf32>
    tpu.vector_store %arg6[%c0_11, %c0_12], %16 {strides = array<i32>} : memref<2x8xf32, #tpu.memory_space<vmem>>, vector<1x8xf32>,
    %18 = vector.extract_strided_slice %9 {offsets = [1, 0], sizes = [1, 8], strides = [1, 1]} : vector<2x8xf32> to vector<1x8xf32>
    %c1 = arith.constant 1 : index
    %19 = memref.load %arg5[%c1] : memref<2xf32, #tpu.memory_space<smem>>
    %20 = vector.broadcast %19 : f32 to vector<1x8xf32>
    %21 = arith.addf %18, %20 : vector<1x8xf32>
    %cst_13 = arith.constant 0.000000e+00 : f32
    %22 = vector.broadcast %cst_13 : f32 to vector<1x8xf32>
    %23 = arith.maximumf %21, %22 : vector<1x8xf32>
    %24 = vector.broadcast %cst_13 : f32 to vector<1x8xf32>
    %25 = arith.subf %21, %24 : vector<1x8xf32>
    %26 = arith.cmpf one, %25, %25 : vector<1x8xf32>
    %27 = vector.broadcast %cst_13 : f32 to vector<1x8xf32>
    %28 = arith.addf %21, %27 : vector<1x8xf32>
    %29 = math.absf %25 : vector<1x8xf32>
    %cst_14 = arith.constant 0.000000e+00 : f32
    %30 = vector.broadcast %cst_14 : f32 to vector<1x8xf32>
    %31 = arith.subf %30, %29 : vector<1x8xf32>
    %32 = math.exp %31 : vector<1x8xf32>
    %33 = math.log1p %32 : vector<1x8xf32>
    %34 = arith.addf %23, %33 : vector<1x8xf32>
    %35 = arith.select %26, %28, %34 : vector<1x8xi1>, vector<1x8xf32>
    %c1_15 = arith.constant 1 : index
    %c0_16 = arith.constant 0 : index
    %36 = vector.load %arg6[%c1_15, %c0_16] : memref<2x8xf32, #tpu.memory_space<vmem>>, vector<1x8xf32>
    tpu.vector_store %arg6[%c1_15, %c0_16], %35 {strides = array<i32>} : memref<2x8xf32, #tpu.memory_space<vmem>>, vector<1x8xf32>,
    return
  }
  func.func @transform_0(%arg0: i32) -> (i32, i32) {
    %c0_i32 = arith.constant 0 : i32
    %c0_i32_0 = arith.constant 0 : i32
    return %c0_i32, %arg0 : i32, i32
  }
  func.func @transform_1(%arg0: i32) -> (i32, i32) {
    %c0_i32 = arith.constant 0 : i32
    %c0_i32_0 = arith.constant 0 : i32
    %c0_i32_1 = arith.constant 0 : i32
    return %c0_i32, %c0_i32_0 : i32, i32
  }
  func.func @transform_2(%arg0: i32) -> (i32, i32) {
    %c0_i32 = arith.constant 0 : i32
    %c0_i32_0 = arith.constant 0 : i32
    %c0_i32_1 = arith.constant 0 : i32
    return %c0_i32, %c0_i32_0 : i32, i32
  }
  func.func @transform_3(%arg0: i32) -> (i32, i32) {
    %c0_i32 = arith.constant 0 : i32
    %c0_i32_0 = arith.constant 0 : i32
    %c0_i32_1 = arith.constant 0 : i32
    return %c0_i32, %c0_i32_0 : i32, i32
  }
  func.func @transform_4(%arg0: i32) -> i32 {
    %c0_i32 = arith.constant 0 : i32
    %c0_i32_0 = arith.constant 0 : i32
    return %c0_i32 : i32
  }
  func.func @transform_5(%arg0: i32) -> (i32, i32) {
    %c0_i32 = arith.constant 0 : i32
    %c0_i32_0 = arith.constant 0 : i32
    return %c0_i32, %arg0 : i32, i32
  }
}

</mosaic_0001>

<bundles_post_ra>
// kernel: tpu_custom_call.1
= control target key start
LH: loop header
LB: loop body
LE: loop exit
PB: predicated region body
PF: predicated region fallthrough
CT: control target
= control target key end

     0   :  { %10 = vsyncpa [#allocation4], 0  ;;  %s579_s0 = inlined_call_operand.vmem [shape: f32[8,8], index: 0, kind: input, shape index: {}]   ;;  %s580_s1 = inlined_call_operand.vmem [shape: f32[128,8], index: 1, kind: input, shape index: {}]   ;;  %s581_s2 = inlined_call_operand.vmem [shape: f32[128,1], index: 2, kind: input, shape index: {}]   ;;  %s582_s3 = inlined_call_operand.vmem [shape: f32[2,128], index: 3, kind: input, shape index: {}]   ;;  %s583_s4 = inlined_call_operand.vmem [shape: f32[2], index: 4, kind: input, shape index: {}]   ;;  %s584_s5 = inlined_call_operand.hbm [shape: f32[2,8], index: 5, kind: output, shape index: {}]  }
   0x1   :  { %11 = vsyncpa [#allocation3], 0  ;;  %s25_s20 = sshll.u32 %s583_s4, 4  ;;  %s416_s21 = smov [#allocation2]   ;;  %s26_s20 = int_to_ptr.vmem [resolvable:$true] %s25_s20 }
   0x2   :  { %28 = dma.vmem_to_smem %s26_s20, 16, %s416_s21, [#allocation4]  }
   0x3   :  { %412 = dma.done.wait [#allocation4], 16  }
   0x4   :  { %413 = vsyncadd [#allocation4], 4294967280 }
   0x5   :  { %33 = sfence }
   0x6   :  { %v50_v0 = vld [vmem:[%s579_s0] sm:$0xff]  ;;  %v66_v1 = vld [vmem:[%s581_s2 + $0x78] sm:$0xff]  ;;  %vm147_vm0 = vcmask 64512   ;;  %v417_v3 = vmov 0   ;;  %v40_v4 = vld [vmem:[%s580_s1 + $0x30] sm:$0xff]  ;;  %s298_s7 = sld [smem:[#allocation2]] }
   0x7   :  { %v34_v2 = vld [vmem:[%s580_s1] sm:$0xff]  ;;  %367 = vset.pattern.permute.xlu0 %v417_v3  ;;  %211 = vmatpush.msra.mxu0 %v50_v0  ;;  %v64_v6 = vld [vmem:[%s581_s2 + $0x68] sm:$0xff]  ;;  %v62_v7 = vld [vmem:[%s581_s2 + $0x58] sm:$0xff]  ;;  %s361_s8 = sld [smem:[#allocation2 + $0x1]]  ;;  %vm303_vm1 = vcmask 57344   ;;  %s335_s12 = sshll.u32 %s584_s5, 4  ;;  %s336_s12 = int_to_ptr.hbm [resolvable:$true] %s335_s12 }
   0x8   :  { %v46_v5 = vld [vmem:[%s580_s1 + $0x60] sm:$0xff]  ;;  %362 = vmatpush.msra.mxu2 %v50_v0  ;;  %363 = vmatpush.msra.mxu3 %v50_v0  ;;  %v65_v8 = vld [vmem:[%s581_s2 + $0x70] sm:$0xff]  ;;  %v35_v9 = vld [vmem:[%s580_s1 + $0x8] sm:$0xff]  ;;  %vm326_vm3 = vcmask 58369  }
   0x9   :  { %144 = vperm.xlu0 %367, %v66_v1   ;;  %345 = vmatmul.msk.f32.vlgmr.msra.gmra.mxu0 %vm147_vm0, %v34_v2  ;;  %v41_v10 = vld [vmem:[%s580_s1 + $0x38] sm:$0xff]  ;;  %v47_v11 = vld [vmem:[%s580_s1 + $0x68] sm:$0xff]  ;;  %v63_v12 = vld [vmem:[%s581_s2 + $0x60] sm:$0xff] }
   0xa   :  { %351 = vmatmul.msk.f32.vlgmr.msra.gmra.mxu2 %vm147_vm0, %v40_v4  ;;  %357 = vmatmul.msk.f32.vlgmr.msra.gmra.mxu3 %vm147_vm0, %v46_v5  ;;  %v61_v13 = vld [vmem:[%s581_s2 + $0x50] sm:$0xff]  ;;  %v60_v14 = vld [vmem:[%s581_s2 + $0x48] sm:$0xff]  ;;  %v42_v16 = vld [vmem:[%s580_s1 + $0x40] sm:$0xff] }
   0xb   :  { %368 = vset.pattern.permute.xlu1 %v417_v3  ;;  %369 = vset.pattern.permute.xlu2 %v417_v3  ;;  %v36_v15 = vld [vmem:[%s580_s1 + $0x10] sm:$0xff]  ;;  %v59_v18 = vld [vmem:[%s581_s2 + $0x40] sm:$0xff]  ;;  %v58_v19 = vld [vmem:[%s581_s2 + $0x38] sm:$0xff] }
   0xc   :  { %134 = vperm.xlu1 %368, %v64_v6   ;;  %124 = vperm.xlu2 %369, %v62_v7   ;;  %v48_v17 = vld [vmem:[%s580_s1 + $0x70] sm:$0xff]  ;;  %v37_v21 = vld [vmem:[%s580_s1 + $0x18] sm:$0xff]  ;;  %v43_v22 = vld [vmem:[%s580_s1 + $0x48] sm:$0xff] }
   0xd   :  { %v57_v20 = vld [vmem:[%s581_s2 + $0x30] sm:$0xff]  ;;  %v49_v23 = vld [vmem:[%s580_s1 + $0x78] sm:$0xff]  ;;  %v56_v24 = vld [vmem:[%s581_s2 + $0x28] sm:$0xff] }
   0xe   :  { %v55_v25 = vld [vmem:[%s581_s2 + $0x20] sm:$0xff]  ;;  %v54_v26 = vld [vmem:[%s581_s2 + $0x18] sm:$0xff]  ;;  %v44_v28 = vld [vmem:[%s580_s1 + $0x50] sm:$0xff] }
   0xf   :  { %v38_v27 = vld [vmem:[%s580_s1 + $0x20] sm:$0xff]  ;;  %v53_v29 = vld [vmem:[%s581_s2 + $0x10] sm:$0xff]  ;;  %v52_v30 = vld [vmem:[%s581_s2 + $0x8] sm:$0xff] }
  0x10   :  { %v51_v31 = vld [vmem:[%s581_s2] sm:$0xff]  ;;  %v39_v32 = vld [vmem:[%s580_s1 + $0x28] sm:$0xff]  ;;  %v45_v33 = vld [vmem:[%s580_s1 + $0x58] sm:$0xff] }
  0x11   :  { %139 = vperm.xlu0 %367, %v65_v8   ;;  %346 = vmatmul.msk.f32.gmra.mxu0 %vm147_vm0, %v35_v9 }
  0x12   :  { %352 = vmatmul.msk.f32.gmra.mxu2 %vm147_vm0, %v41_v10  ;;  %358 = vmatmul.msk.f32.gmra.mxu3 %vm147_vm0, %v47_v11 }
  0x14   :  { %129 = vperm.xlu1 %368, %v63_v12   ;;  %119 = vperm.xlu2 %369, %v61_v13  }
  0x19   :  { %114 = vperm.xlu0 %367, %v60_v14   ;;  %347 = vmatmul.msk.f32.gmra.mxu0 %vm147_vm0, %v36_v15 }
  0x1a   :  { %353 = vmatmul.msk.f32.gmra.mxu2 %vm147_vm0, %v42_v16  ;;  %359 = vmatmul.msk.f32.gmra.mxu3 %vm147_vm0, %v48_v17 }
  0x1c   :  { %109 = vperm.xlu1 %368, %v59_v18   ;;  %104 = vperm.xlu2 %369, %v58_v19  }
  0x21   :  { %99 = vperm.xlu0 %367, %v57_v20   ;;  %348 = vmatmul.msk.f32.gmra.mxu0 %vm147_vm0, %v37_v21 }
  0x22   :  { %354 = vmatmul.msk.f32.gmra.mxu2 %vm147_vm0, %v43_v22  ;;  %360 = vmatmul.msk.f32.gmra.mxu3 %vm147_vm0, %v49_v23 }
  0x24   :  { %94 = vperm.xlu1 %368, %v56_v24   ;;  %89 = vperm.xlu2 %369, %v55_v25  }
  0x29   :  { %84 = vperm.xlu0 %367, %v54_v26   ;;  %349 = vmatmul.msk.f32.gmra.mxu0 %vm147_vm0, %v38_v27 }
  0x2a   :  { %355 = vmatmul.msk.f32.gmra.mxu2 %vm147_vm0, %v44_v28 }
  0x2c   :  { %79 = vperm.xlu1 %368, %v53_v29   ;;  %74 = vperm.xlu2 %369, %v52_v30  }
  0x31   :  { %69 = vperm.xlu0 %367, %v51_v31   ;;  %350 = vmatmul.msk.f32.gmra.mxu0 %vm147_vm0, %v39_v32 }
  0x32   :  { %356 = vmatmul.msk.f32.gmra.mxu2 %vm147_vm0, %v45_v33 }
  0x66   :  { %v125_v42 = vpop.permute.xlu2 %124 }
  0x6e   :  { %v120_v52 = vpop.permute.xlu2 %119 }
  0x76   :  { %v105_v63 = vpop.permute.xlu2 %104 }
  0x7b   :  { %v145_v37 = vpop.permute.xlu0 %144 }
  0x7e   :  { %v135_v41 = vpop.permute.xlu1 %134  ;;  %v90_v10 = vpop.permute.xlu2 %89 }
  0x83   :  { %v140_v45 = vpop.permute.xlu0 %139 }
  0x86   :  { %v567_v34 = vpop.f32.mrf.mxu0  ;;  %v130_v47 = vpop.permute.xlu1 %129 }
  0x87   :  { %v75_v24 = vpop.permute.xlu2 %74 }
  0x8b   :  { %v115_v55 = vpop.permute.xlu0 %114 }
  0x8d   :  { %v231_v35 = vpop.f32.mrf.mxu2  ;;  %v249_v36 = vpop.f32.mrf.mxu3 }
  0x8e   :  { %v569_v38 = vpop.f32.mrf.mxu0  ;;  %v250_v57 = vadd.f32 %v249_v36, %v130_v47  ;;  %v110_v62 = vpop.permute.xlu1 %109  ;;  %v299_v36 = vstv %s298_s7 }
  0x8f   :  { %v217_v29 = vadd.f32 %v569_v38, %v75_v24 }
  0x90   :  { %v273_v61 = vmax.f32 %v250_v57, 0.0 }
  0x91   :  { %v262_v32 = vmax.f32 %v217_v29, 0.0 }
  0x93   :  { %v100_v0 = vpop.permute.xlu0 %99 }
  0x94   :  { %v232_v15 = vadd.f32 %v231_v35, %v100_v0  ;;  %v277_v35 = vld [vmem:[%s582_s3] sm:$0x3]  ;;  %s418_s3 = smov [#allocation5]  }
  0x95   :  { %v234_v39 = vpop.f32.mrf.mxu2  ;;  %v252_v40 = vpop.f32.mrf.mxu3  ;;  %s333_s9 = sshll.u32 %s418_s3, 4  ;;  %s334_s9 = int_to_ptr.vmem [resolvable:$true] %s333_s9 }
  0x96   :  { %v219_v46 = vpop.f32.mrf.mxu0  ;;  %v253_v53 = vadd.f32 %v252_v40, %v135_v41  ;;  %v95_v7 = vpop.permute.xlu1 %94  ;;  %v235_v11 = vadd.f32 %v234_v39, %v105_v63  ;;  %v267_v19 = vmax.f32 %v232_v15, 0.0 }
  0x98   :  { %v274_v59 = vmax.f32 %v253_v53, 0.0  ;;  %v268_v17 = vmax.f32 %v235_v11, 0.0 }
  0x9b   :  { %v85_v13 = vpop.permute.xlu0 %84 }
  0x9d   :  { %v237_v43 = vpop.f32.mrf.mxu2  ;;  %v255_v44 = vpop.f32.mrf.mxu3 }
  0x9e   :  { %v256_v50 = vadd.f32 %v255_v44, %v140_v45  ;;  %v222_v56 = vpop.f32.mrf.mxu0  ;;  %v238_v8 = vadd.f32 %v237_v43, %v110_v62  ;;  %v80_v21 = vpop.permute.xlu1 %79 }
  0x9f   :  { %v223_v22 = vadd.f32 %v222_v56, %v85_v13  ;;  %v220_v25 = vadd.f32 %v219_v46, %v80_v21 }
  0xa0   :  { %v275_v58 = vmax.f32 %v256_v50, 0.0  ;;  %v269_v16 = vmax.f32 %v238_v8, 0.0 }
  0xa1   :  { %v264_v28 = vmax.f32 %v223_v22, 0.0  ;;  %v263_v31 = vmax.f32 %v220_v25, 0.0 }
  0xa3   :  { %v70_v27 = vpop.permute.xlu0 %69 }
  0xa4   :  { %v214_v30 = vadd.f32 %v567_v34, %v70_v27 }
  0xa5   :  { %v240_v48 = vpop.f32.mrf.mxu2  ;;  %v258_v49 = vpop.f32.mrf.mxu3 }
  0xa6   :  { %v259_v51 = vadd.f32 %v258_v49, %v145_v37  ;;  %v225_v1 = vpop.f32.mrf.mxu0  ;;  %v241_v5 = vadd.f32 %v240_v48, %v115_v55  ;;  %v261_v33 = vmax.f32 %v214_v30, 0.0  ;;  %v306_v37 = vstv %s361_s8 }
  0xa7   :  { %v226_v20 = vadd.f32 %v225_v1, %v90_v10 }
  0xa8   :  { %v276_v54 = vmax.f32 %v259_v51, 0.0  ;;  %v270_v12 = vmax.f32 %v241_v5, 0.0 }
  0xa9   :  { %v265_v26 = vmax.f32 %v226_v20, 0.0 }
  0xaa   :  { %278 = vmatpush.msra.mxu1 %v276_v54 }
  0xac   :  { %279 = vmatpush.msra.mxu1 %v275_v58 }
  0xad   :  { %v243_v60 = vpop.f32.mrf.mxu2 }
  0xae   :  { %280 = vmatpush.msra.mxu1 %v274_v59  ;;  %v244_v3 = vadd.f32 %v243_v60, %v120_v52  ;;  %v228_v14 = vpop.f32.mrf.mxu0 }
  0xaf   :  { %v229_v18 = vadd.f32 %v228_v14, %v95_v7 }
  0xb0   :  { %281 = vmatpush.msra.mxu1 %v273_v61  ;;  %v271_v9 = vmax.f32 %v244_v3, 0.0 }
  0xb1   :  { %v266_v23 = vmax.f32 %v229_v18, 0.0 }
  0xb5   :  { %v246_v2 = vpop.f32.mrf.mxu2 }
  0xb6   :  { %v247_v4 = vadd.f32 %v246_v2, %v125_v42 }
  0xb8   :  { %v272_v6 = vmax.f32 %v247_v4, 0.0 }
  0xba   :  { %282 = vmatpush.msra.mxu1 %v272_v6 }
  0xbc   :  { %283 = vmatpush.msra.mxu1 %v271_v9 }
  0xbe   :  { %284 = vmatpush.msra.mxu1 %v270_v12 }
  0xc0   :  { %285 = vmatpush.msra.mxu1 %v269_v16 }
  0xc2   :  { %286 = vmatpush.msra.mxu1 %v268_v17 }
  0xc4   :  { %287 = vmatpush.msra.mxu1 %v267_v19 }
  0xc6   :  { %288 = vmatpush.msra.mxu1 %v266_v23 }
  0xc8   :  { %289 = vmatpush.msra.mxu1 %v265_v26 }
  0xca   :  { %290 = vmatpush.msra.mxu1 %v264_v28 }
  0xcc   :  { %291 = vmatpush.msra.mxu1 %v263_v31 }
  0xce   :  { %292 = vmatpush.msra.mxu1 %v262_v32 }
  0xd0   :  { %293 = vmatpush.msra.mxu1 %v261_v33 }
  0xd1   :  { %294 = vmatmul.f32.vlgmr.msra.gmra.mxu1 %v277_v35 }
 0x14e   :  { %v295_v38 = vpop.f32.mrf.mxu1 }
 0x14f   :  { %v300_v39 = vadd.f32 %v299_v36, %v295_v38  ;;  %v307_v40 = vadd.f32 %v306_v37, %v295_v38 }
 0x151   :  { %370 = vtanh.f32 %v300_v39  ;;  %v311_v34 = vand.u32 2147483647, %v307_v40  ;;  %v308_v53 = vmax.f32 %v307_v40, 0.0  ;;  %vm309_vm4 = vcmp.ne.f32.partialorder %v307_v40, %v307_v40 }
 0x153   :  { %v312_v41 = vsub.f32 0.0, %v311_v34 }
 0x155   :  { %v313_v42 = vmul.f32 1.442695, %v312_v41 }
 0x157   :  { %v371_v43 = vpop.eup %370  ;;  %372 = vpow2.f32 %v313_v42 }
 0x158   :  { %v302_v44 = vmul.f32 2.0, %v371_v43 }
 0x15a   :  { %304 = vst.msk [vmem:[#allocation5] sm:$0x1] %vm303_vm1, %v302_v44 }
 0x15d   :  { %v373_v45 = vpop.eup %372 }
 0x15e   :  { %v315_v46 = vadd.f32 1.0, %v373_v45  ;;  %v318_v47 = vmul.f32 -0.5, %v373_v45  ;;  %v321_v49 = vand.u32 2147483647, %v373_v45 }
 0x160   :  { %374 = vlog2.f32 %v315_v46  ;;  %v319_v48 = vadd.f32 1.0, %v318_v47  ;;  %vm322_vm2 = vcmp.lt.f32.partialorder %v321_v49, 0.0004427343 }
 0x162   :  { %v320_v52 = vmul.f32 %v373_v45, %v319_v48 }
 0x166   :  { %v375_v50 = vpop.eup %374 }
 0x167   :  { %v317_v51 = vmul.f32 0.6931472, %v375_v50 }
 0x169   :  { %v323_v54 = vsel %vm322_vm2, %v320_v52, %v317_v51 }
 0x16a   :  { %v324_v55 = vadd.f32 %v323_v54, %v308_v53 }
 0x16c   :  { %v325_v56 = vsel %vm309_vm4, %v307_v40, %v324_v55 }
 0x16d   :  { %327 = vst.msk [vmem:[#allocation5] sm:$0x2] %vm326_vm3, %v325_v56 }
 0x16e   :  { %338 = dma.vmem_to_hbm [thread:$0]  %s334_s9, 32, %s336_s12, [#allocation3]  }
 0x16f   :  { %414 = dma.done.wait [#allocation3], 32  }
 0x170   :  { %415 = vsyncadd [#allocation3], 4294967264 }
 0x171   :  { %343 = vsyncpa [#allocation3], 1 }
 0x172   :  { %344 = vsyncpa [#allocation4], 1 }

</bundles_post_ra>
